<compile_context>
chip_gen: v7x
topology: tpu7x:2x2x1
jax: 0.10.0
libtpu: 0.0.40
codegen_flags: <defaults>
</compile_context>

<pallas_src>
import jax
import jax.numpy as jnp
from jax.experimental import pallas as pl
from jax.experimental.pallas import tpu as pltpu

# Tap order shared by the weight folding (columns) and the kernel (patch rows).
# (dh, dw) = offset of the contributing input pixel relative to the phase pixel.
_TAPS = tuple((dh, dw) for dh in (-1, 0, 1) for dw in (-1, 0, 1))


def _round_up(x, m):
    return (x + m - 1) // m * m


def _make_deconv_kernel(cin, wp, lanes, margin):
    def kernel(x_ref, w_ref, b_ref, o_ref, patch_ref):
        # x_ref:     (Cin, PADW)   bf16 fused, zero-padded, flattened batch
        # w_ref:     (R, KD)       bf16 phase-folded weight, R = 4*Cout, KD = 9*Cin
        # b_ref:     (R, 1)        f32 per-output-row bias
        # o_ref:     (R, LANES)    f32 phase-separated output, LANES % 128 == 0
        # patch_ref: (KD, LANES)   bf16 scratch: fused-im2col patch matrix
        #
        # 1) fused im2col: one shifted-window vector copy per tap. x is already
        #    resident in VMEM, so these are plain vld/vst (no DMA, no semaphores).
        for d, (dh, dw) in enumerate(_TAPS):
            start = margin + dh * wp + dw                       # static Python int
            patch_ref[pl.ds(d * cin, cin), :] = x_ref[:, pl.ds(start, lanes)]

        # 2) single lane-dense MXU matmul (bf16 x bf16 -> f32 acc) + bias + ReLU.
        acc = jnp.dot(w_ref[...], patch_ref[...],
                      preferred_element_type=jnp.float32)
        acc = acc + b_ref[...]                                  # (R,1) lane broadcast
        o_ref[...] = jnp.maximum(acc, 0.0).astype(o_ref.dtype)

    return kernel


def fold_deconv_params(weight, bias, compute_dtype=jnp.bfloat16):
    """Fold ConvTranspose2d(k=4, s=2, p=1) params into a phase-matmul matrix.

    Row r = co*4 + rh*2 + rw (rh/rw = output row/col parity).  Column d*Cin + ci
    multiplies x[ci, oh'+dh, ow'+dw] with (dh, dw) = _TAPS[d].  Call once and
    reuse across forward calls (hoisted out of the per-call path).
    """
    cin, cout, k, _ = weight.shape
    r_rows = 4 * cout
    kd = len(_TAPS) * cin
    wk = jnp.zeros((r_rows, kd), jnp.float32)
    for d, (dh, dw) in enumerate(_TAPS):
        for rh in range(2):
            kh = rh + 1 - 2 * dh          # from oh = 2*ih - 1 + kh, ih = oh' + dh
            if not 0 <= kh < k:
                continue
            for rw in range(2):
                kw = rw + 1 - 2 * dw
                if not 0 <= kw < k:
                    continue
                wk = wk.at[rh * 2 + rw::4, d * cin:(d + 1) * cin].set(
                    weight[:, :, kh, kw].T)
    bias_col = jnp.repeat(bias.astype(jnp.float32), 4).reshape(r_rows, 1)
    return wk.astype(compute_dtype), bias_col


@jax.jit
def deconv_apply(x, wk, bias_col):
    """ConvTranspose2d(k=4, s=2, p=1) + bias + ReLU with pre-folded params.

    x: [N, Cin, H, W] (NCHW).  wk/bias_col come from fold_deconv_params.
    """
    n, cin, h, w = x.shape
    r_rows, kd = wk.shape
    cout = r_rows // 4
    compute_dtype = wk.dtype

    wp = w + 2                          # one zero column each side inside a row
    seg = (h + 2) * wp                  # per-sample flat length (incl. zero rows)
    lanes = _round_up(n * seg, 128)     # lane-dense fused output width (768 here)
    margin = wp + 1                     # largest |tap shift| in flat index space
    padw = margin + lanes + margin

    # --- tiny input prep (<20 KiB): spatial zero pad, flatten, fuse batch, bf16.
    x_pad = jnp.pad(x, ((0, 0), (0, 0), (1, 1), (1, wp - w - 1)))  # (N,Cin,H+2,Wp)
    x_flat = x_pad.reshape(n, cin, seg).transpose(1, 0, 2).reshape(cin, n * seg)
    x_fused = jnp.pad(x_flat, ((0, 0), (margin, padw - margin - n * seg)))
    x_fused = x_fused.astype(compute_dtype)                        # (Cin, PADW)

    out = pl.pallas_call(
        _make_deconv_kernel(cin, wp, lanes, margin),
        out_shape=jax.ShapeDtypeStruct((r_rows, lanes), jnp.float32),
        grid_spec=pltpu.PrefetchScalarGridSpec(
            num_scalar_prefetch=0,
            grid=(1,),                  # single fused step: kernel is overhead-bound
            in_specs=[
                pl.BlockSpec((cin, padw), lambda i: (0, 0)),
                pl.BlockSpec((r_rows, kd), lambda i: (0, 0)),
                pl.BlockSpec((r_rows, 1), lambda i: (0, 0)),
            ],
            out_specs=pl.BlockSpec((r_rows, lanes), lambda i: (0, 0)),
            scratch_shapes=[pltpu.VMEM((kd, lanes), compute_dtype)],
        ),
        compiler_params=pltpu.CompilerParams(
            dimension_semantics=("arbitrary",)),
    )(x_fused, wk, bias_col)

    # --- small XLA epilogue (~100 KiB): strip pad rows/cols, interleave 2x2 phases.
    o = out[:, :n * seg].reshape(cout, 2, 2, n, h + 2, wp)
    o = o[:, :, :, :, 1:h + 1, 1:w + 1]                   # (Cout, 2, 2, N, H, W)
    o = o.transpose(3, 0, 4, 1, 5, 2).reshape(n, cout, 2 * h, 2 * w)
    return o.astype(x.dtype)


def deconv_layer_forward(x, weight, bias, *, stride=2, padding=1):
    """Convenience wrapper matching the original call signature."""
    k = weight.shape[-1]
    if not (stride == 2 and padding == 1 and k == 4):
        raise NotImplementedError(
            "Pallas kernel is specialized to kernel=4, stride=2, padding=1.")
    wk, bias_col = fold_deconv_params(weight, bias)
    return deconv_apply(x, wk, bias_col)


def _reference_deconv_relu(x, weight, bias, stride, padding):
    """Plain-JAX reference: direct scatter definition of ConvTranspose2d + ReLU."""
    n, cin, h, w = x.shape
    _, cout, k, _ = weight.shape
    ho = (h - 1) * stride - 2 * padding + k
    wo = (w - 1) * stride - 2 * padding + k
    full = jnp.zeros((n, cout, (h - 1) * stride + k, (w - 1) * stride + k),
                     jnp.float32)
    for kh in range(k):
        for kw in range(k):
            contrib = jnp.einsum("nihw,io->nohw", x, weight[:, :, kh, kw])
            full = full.at[:, :, kh:kh + (h - 1) * stride + 1:stride,
                           kw:kw + (w - 1) * stride + 1:stride].add(contrib)
    out = full[:, :, padding:padding + ho, padding:padding + wo]
    out = out + bias[None, :, None, None]
    return jnp.maximum(out, 0.0)


if __name__ == "__main__":
    in_c, out_c, kernel_size, stride, padding = 4, 8, 4, 2, 1
    n, h, w = 2, 16, 16

    key = jax.random.PRNGKey(0)
    kx, kw_, kb = jax.random.split(key, 3)
    x = jax.random.normal(kx, (n, in_c, h, w), dtype=jnp.float32)
    # PyTorch ConvTranspose2d weight layout: [in_c, out_c, K, K]
    weight = 0.1 * jax.random.normal(
        kw_, (in_c, out_c, kernel_size, kernel_size), dtype=jnp.float32)
    bias = 0.1 * jax.random.normal(kb, (out_c,), dtype=jnp.float32)

    # Fold weights once (hoisted out of the per-call path), then run the kernel.
    wk, bias_col = fold_deconv_params(weight, bias)
    y = deconv_apply(x, wk, bias_col)
    jax.block_until_ready(y)

    expected_shape = (n, out_c, 2 * h, 2 * w)
    assert y.shape == expected_shape, (y.shape, expected_shape)

    # Self-check: compare against a plain-JAX reference evaluated on the same
    # bf16-rounded inputs the kernel consumes (bf16 products are exact in f32 and
    # both sides accumulate in f32), so the tolerance can stay tight.
    x_q = x.astype(jnp.bfloat16).astype(jnp.float32)
    w_q = weight.astype(jnp.bfloat16).astype(jnp.float32)
    y_ref = _reference_deconv_relu(x_q, w_q, bias, stride, padding)
    max_err = float(jnp.max(jnp.abs(y - y_ref)))
    assert max_err < 1e-3, f"numerical mismatch vs reference: {max_err}"

    print("KERNEL_OK")
</pallas_src>

<mosaic_0001>
module attributes {stable_mosaic.version = 11 : i64} {
  func.func @kernel(%arg0: i32, %arg1: memref<4x806xbf16, #tpu.memory_space<vmem>>, %arg2: memref<32x36xbf16, #tpu.memory_space<vmem>>, %arg3: memref<32x1xf32, #tpu.memory_space<vmem>>, %arg4: memref<32x768xf32, #tpu.memory_space<vmem>>, %arg5: memref<36x768xbf16, #tpu.memory_space<vmem>>) attributes {dimension_semantics = [#tpu.dimension_semantics<arbitrary>], iteration_bounds = array<i64: 1>, scalar_prefetch = 0 : i64, scratch_operands = 1 : i64, tpu.core_type = #tpu.core_type<tc>, window_params = [{pipeline_mode = #tpu.pipeline_mode<synchronous>, transform_indices = @transform_0, window_bounds = array<i64: 4, 806>}, {pipeline_mode = #tpu.pipeline_mode<synchronous>, transform_indices = @transform_1, window_bounds = array<i64: 32, 36>}, {pipeline_mode = #tpu.pipeline_mode<synchronous>, transform_indices = @transform_2, window_bounds = array<i64: 32, 1>}, {pipeline_mode = #tpu.pipeline_mode<synchronous>, transform_indices = @transform_3, window_bounds = array<i64: 32, 768>}]} {
    %c0 = arith.constant 0 : index
    %c0_0 = arith.constant 0 : index
    %0 = vector.load %arg1[%c0, %c0_0] : memref<4x806xbf16, #tpu.memory_space<vmem>>, vector<4x768xbf16>
    %c0_1 = arith.constant 0 : index
    %c0_2 = arith.constant 0 : index
    %1 = vector.load %arg5[%c0_1, %c0_2] : memref<36x768xbf16, #tpu.memory_space<vmem>>, vector<4x768xbf16>
    tpu.vector_store %arg5[%c0_1, %c0_2], %0 {strides = array<i32>} : memref<36x768xbf16, #tpu.memory_space<vmem>>, vector<4x768xbf16>,
    %c0_3 = arith.constant 0 : index
    %c1 = arith.constant 1 : index
    %2 = vector.load %arg1[%c0_3, %c1] : memref<4x806xbf16, #tpu.memory_space<vmem>>, vector<4x768xbf16>
    %c4 = arith.constant 4 : index
    %c0_4 = arith.constant 0 : index
    %3 = vector.load %arg5[%c4, %c0_4] : memref<36x768xbf16, #tpu.memory_space<vmem>>, vector<4x768xbf16>
    tpu.vector_store %arg5[%c4, %c0_4], %2 {strides = array<i32>} : memref<36x768xbf16, #tpu.memory_space<vmem>>, vector<4x768xbf16>,
    %c0_5 = arith.constant 0 : index
    %c2 = arith.constant 2 : index
    %4 = vector.load %arg1[%c0_5, %c2] : memref<4x806xbf16, #tpu.memory_space<vmem>>, vector<4x768xbf16>
    %c8 = arith.constant 8 : index
    %c0_6 = arith.constant 0 : index
    %5 = vector.load %arg5[%c8, %c0_6] : memref<36x768xbf16, #tpu.memory_space<vmem>>, vector<4x768xbf16>
    tpu.vector_store %arg5[%c8, %c0_6], %4 {strides = array<i32>} : memref<36x768xbf16, #tpu.memory_space<vmem>>, vector<4x768xbf16>,
    %c0_7 = arith.constant 0 : index
    %c18 = arith.constant 18 : index
    %6 = vector.load %arg1[%c0_7, %c18] : memref<4x806xbf16, #tpu.memory_space<vmem>>, vector<4x768xbf16>
    %c12 = arith.constant 12 : index
    %c0_8 = arith.constant 0 : index
    %7 = vector.load %arg5[%c12, %c0_8] : memref<36x768xbf16, #tpu.memory_space<vmem>>, vector<4x768xbf16>
    tpu.vector_store %arg5[%c12, %c0_8], %6 {strides = array<i32>} : memref<36x768xbf16, #tpu.memory_space<vmem>>, vector<4x768xbf16>,
    %c0_9 = arith.constant 0 : index
    %c19 = arith.constant 19 : index
    %8 = vector.load %arg1[%c0_9, %c19] : memref<4x806xbf16, #tpu.memory_space<vmem>>, vector<4x768xbf16>
    %c16 = arith.constant 16 : index
    %c0_10 = arith.constant 0 : index
    %9 = vector.load %arg5[%c16, %c0_10] : memref<36x768xbf16, #tpu.memory_space<vmem>>, vector<4x768xbf16>
    tpu.vector_store %arg5[%c16, %c0_10], %8 {strides = array<i32>} : memref<36x768xbf16, #tpu.memory_space<vmem>>, vector<4x768xbf16>,
    %c0_11 = arith.constant 0 : index
    %c20 = arith.constant 20 : index
    %10 = vector.load %arg1[%c0_11, %c20] : memref<4x806xbf16, #tpu.memory_space<vmem>>, vector<4x768xbf16>
    %c20_12 = arith.constant 20 : index
    %c0_13 = arith.constant 0 : index
    %11 = vector.load %arg5[%c20_12, %c0_13] : memref<36x768xbf16, #tpu.memory_space<vmem>>, vector<4x768xbf16>
    tpu.vector_store %arg5[%c20_12, %c0_13], %10 {strides = array<i32>} : memref<36x768xbf16, #tpu.memory_space<vmem>>, vector<4x768xbf16>,
    %c0_14 = arith.constant 0 : index
    %c36 = arith.constant 36 : index
    %12 = vector.load %arg1[%c0_14, %c36] : memref<4x806xbf16, #tpu.memory_space<vmem>>, vector<4x768xbf16>
    %c24 = arith.constant 24 : index
    %c0_15 = arith.constant 0 : index
    %13 = vector.load %arg5[%c24, %c0_15] : memref<36x768xbf16, #tpu.memory_space<vmem>>, vector<4x768xbf16>
    tpu.vector_store %arg5[%c24, %c0_15], %12 {strides = array<i32>} : memref<36x768xbf16, #tpu.memory_space<vmem>>, vector<4x768xbf16>,
    %c0_16 = arith.constant 0 : index
    %c37 = arith.constant 37 : index
    %14 = vector.load %arg1[%c0_16, %c37] : memref<4x806xbf16, #tpu.memory_space<vmem>>, vector<4x768xbf16>
    %c28 = arith.constant 28 : index
    %c0_17 = arith.constant 0 : index
    %15 = vector.load %arg5[%c28, %c0_17] : memref<36x768xbf16, #tpu.memory_space<vmem>>, vector<4x768xbf16>
    tpu.vector_store %arg5[%c28, %c0_17], %14 {strides = array<i32>} : memref<36x768xbf16, #tpu.memory_space<vmem>>, vector<4x768xbf16>,
    %c0_18 = arith.constant 0 : index
    %c38 = arith.constant 38 : index
    %16 = vector.load %arg1[%c0_18, %c38] : memref<4x806xbf16, #tpu.memory_space<vmem>>, vector<4x768xbf16>
    %c32 = arith.constant 32 : index
    %c0_19 = arith.constant 0 : index
    %17 = vector.load %arg5[%c32, %c0_19] : memref<36x768xbf16, #tpu.memory_space<vmem>>, vector<4x768xbf16>
    tpu.vector_store %arg5[%c32, %c0_19], %16 {strides = array<i32>} : memref<36x768xbf16, #tpu.memory_space<vmem>>, vector<4x768xbf16>,
    %c0_20 = arith.constant 0 : index
    %c0_21 = arith.constant 0 : index
    %18 = vector.load %arg2[%c0_20, %c0_21] : memref<32x36xbf16, #tpu.memory_space<vmem>>, vector<32x36xbf16>
    %c0_22 = arith.constant 0 : index
    %c0_23 = arith.constant 0 : index
    %19 = vector.load %arg5[%c0_22, %c0_23] : memref<36x768xbf16, #tpu.memory_space<vmem>>, vector<36x768xbf16>
    %cst = arith.constant dense<0.000000e+00> : vector<32x768xf32>
    %20 = tpu.matmul %18, %19, %cst {dimension_numbers = #tpu.dot_dimension_numbers<[1], [0], [0], [1], [0, 0, 1, 1], [], []>} : vector<32x36xbf16>, vector<36x768xbf16>, vector<32x768xf32> -> vector<32x768xf32>
    %c0_24 = arith.constant 0 : index
    %c0_25 = arith.constant 0 : index
    %21 = vector.load %arg3[%c0_24, %c0_25] : memref<32x1xf32, #tpu.memory_space<vmem>>, vector<32x1xf32>
    %22 = vector.broadcast %21 : vector<32x1xf32> to vector<32x768xf32>
    %23 = arith.addf %20, %22 : vector<32x768xf32>
    %cst_26 = arith.constant 0.000000e+00 : f32
    %24 = vector.broadcast %cst_26 : f32 to vector<32x768xf32>
    %25 = arith.maximumf %23, %24 : vector<32x768xf32>
    %c0_27 = arith.constant 0 : index
    %c0_28 = arith.constant 0 : index
    %26 = vector.load %arg4[%c0_27, %c0_28] : memref<32x768xf32, #tpu.memory_space<vmem>>, vector<32x768xf32>
    tpu.vector_store %arg4[%c0_27, %c0_28], %25 {strides = array<i32>} : memref<32x768xf32, #tpu.memory_space<vmem>>, vector<32x768xf32>,
    return
  }
  func.func @transform_0(%arg0: i32) -> (i32, i32) {
    %c0_i32 = arith.constant 0 : i32
    %c0_i32_0 = arith.constant 0 : i32
    %c0_i32_1 = arith.constant 0 : i32
    return %c0_i32, %c0_i32_0 : i32, i32
  }
  func.func @transform_1(%arg0: i32) -> (i32, i32) {
    %c0_i32 = arith.constant 0 : i32
    %c0_i32_0 = arith.constant 0 : i32
    %c0_i32_1 = arith.constant 0 : i32
    return %c0_i32, %c0_i32_0 : i32, i32
  }
  func.func @transform_2(%arg0: i32) -> (i32, i32) {
    %c0_i32 = arith.constant 0 : i32
    %c0_i32_0 = arith.constant 0 : i32
    %c0_i32_1 = arith.constant 0 : i32
    return %c0_i32, %c0_i32_0 : i32, i32
  }
  func.func @transform_3(%arg0: i32) -> (i32, i32) {
    %c0_i32 = arith.constant 0 : i32
    %c0_i32_0 = arith.constant 0 : i32
    %c0_i32_1 = arith.constant 0 : i32
    return %c0_i32, %c0_i32_0 : i32, i32
  }
}

</mosaic_0001>

<bundles_post_ra>
// kernel: deconv_apply.1
= control target key start
LH: loop header
LB: loop body
LE: loop exit
PB: predicated region body
PF: predicated region fallthrough
CT: control target
= control target key end

     0   :  { %v55_v0 = vlaneseq  ;;  %v971_v2 = vmov 1983009808   ;;  %s972_s16 = smov 127   ;;  %s973_s19 = smov 126   ;;  %v980_v40 = vmov 0   ;;  %vm93_vm0 = vcmask 1043456   ;;  %s1328_s0 = inlined_call_operand.vmem [shape: bf16[4,806], index: 0, kind: input, shape index: {}]   ;;  %s1329_s1 = inlined_call_operand.vmem [shape: bf16[32,36], index: 1, kind: input, shape index: {}]   ;;  %s1330_s2 = inlined_call_operand.vmem [shape: f32[32,1], index: 2, kind: input, shape index: {}]   ;;  %s1331_s3 = inlined_call_operand.vmem [shape: f32[32,768], index: 3, kind: output, shape index: {}]  }
   0x1   :  { %v1004_v1 = vld [vmem:[%s1328_s0 + $0x8] sm:$0x3f]  ;;  %v53_v3 = vunpack.c.l.s4 %v971_v2  ;;  %v47_v4 = vld [vmem:[%s1328_s0] sm:$0xff]  ;;  %s974_s22 = smov 110   ;;  %s975_s25 = smov 109   ;;  %706 = vmatprep.mubr.bf16.mxu0 %v980_v40  ;;  %759 = vmatprep.mubr.bf16.mxu1 %v980_v40  ;;  %v541_v48 = vld [vmem:[%s1330_s2 + $0x10] sm:$0xff] }
   0x2   :  { %v56_v5 = vshrl.u32 %v55_v0, 7  ;;  %v111_v6 = vcombine.high %v47_v4, %v47_v4  ;;  %886 = vst.sshfl [vmem:[#allocation2] sm:$0xf pattern:$0x76325410] %v47_v4  ;;  %v66_v8 = vcombine.low %v1004_v1, %v1004_v1  ;;  %v51_v9 = vcombine.low %v47_v4, %v47_v4  ;;  %s976_s28 = smov 108   ;;  %934 = vset.pattern.permute.xlu1 %v980_v40 }
   0x3   :  { %v54_v7 = vunpack.c.0.s8 %v53_v3  ;;  %v108_v14 = vld [vmem:[%s1328_s0 + $0x8] sm:$0x3f]  ;;  %s977_s4 = smov 92   ;;  %s978_s7 = smov 91   ;;  %933 = vset.pattern.permute.xlu0 %v980_v40  ;;  %v539_v47 = vld [vmem:[%s1330_s2] sm:$0xff]  ;;  %v542_v49 = vld [vmem:[%s1330_s2 + $0x18] sm:$0xff] }
   0x4   :  { %887 = vst.sshfl [vmem:[#allocation2 + $0x8] sm:$0xf pattern:$0x76325410] %v111_v6  ;;  %v167_v17 = vld [vmem:[%s1328_s0 + $0x8] sm:$0x3f]  ;;  %v126_v33 = vcombine.high %v108_v14, %v108_v14 }
   0x5   :  { %v1011_v10 = vsub.s32 %v54_v7, %v56_v5  ;;  %v185_v18 = vcombine.low %v167_v17, %v167_v17  ;;  %v226_v20 = vld [vmem:[%s1328_s0 + $0x8] sm:$0x3f]  ;;  %s979_s12 = smov 90   ;;  %vm95_vm1 = vcmask 1039360   ;;  %vm154_vm2 = vcmask 1031168  }
   0x6   :  { %v285_v22 = vld [vmem:[%s1328_s0 + $0x8] sm:$0x3f]  ;;  %v244_v36 = vcombine.high %v226_v20, %v226_v20  ;;  %vm213_vm3 = vcmask 900096   ;;  %vm272_vm4 = vcmask 891904   ;;  %vm331_vm5 = vcmask 883712  }
   0x7   :  { %v73_v11 = vrot.slane %v66_v8, %v1011_v10  ;;  %v58_v12 = vrot.slane %v51_v9, %v1011_v10  ;;  %v118_v13 = vrot.slane %v47_v4, %v1011_v10  ;;  %v133_v15 = vrot.slane %v108_v14, %v1011_v10  ;;  %v344_v25 = vld [vmem:[%s1328_s0 + $0x8] sm:$0x3f] }
   0x8   :  { %v125_v16 = vrot.slane %v111_v6, %v1011_v10  ;;  %v192_v19 = vrot.slane %v185_v18, %v1011_v10  ;;  %v251_v21 = vrot.slane %v226_v20, %v1011_v10  ;;  %v303_v23 = vcombine.low %v285_v22, %v285_v22  ;;  %v403_v27 = vld [vmem:[%s1328_s0 + $0x8] sm:$0x3f] }
   0x9   :  { %85 = vrot.lane.b32.xlu1 %v73_v11, %s972_s16  ;;  %81 = vrot.lane.b32.xlu0 %v58_v12, %s972_s16  ;;  %v369_v26 = vrot.slane %v344_v25, %v1011_v10  ;;  %v421_v28 = vcombine.low %v403_v27, %v403_v27  ;;  %v462_v30 = vld [vmem:[%s1328_s0 + $0x8] sm:$0x3f]  ;;  %v140_v34 = vrot.slane %v126_v33, %v1011_v10  ;;  %vm390_vm6 = vcmask 752640  }
   0xa   :  { %v310_v24 = vrot.slane %v303_v23, %v1011_v10  ;;  %v885_v31 = vld.sshfl [vmem:[%s1328_s0 + $0x8] sm:$0x33 pattern:$0x76325410]  ;;  %v487_v32 = vrot.slane %v462_v30, %v1011_v10  ;;  %v80_v35 = vrot.slane %v1004_v1, %v1011_v10  ;;  %v258_v37 = vrot.slane %v244_v36, %v1011_v10 }
   0xb   :  { %v428_v29 = vrot.slane %v421_v28, %v1011_v10  ;;  %46 = vst [vmem:[#allocation2 + $0x10] sm:$0x33] %v885_v31  ;;  %v199_v38 = vrot.slane %v167_v17, %v1011_v10  ;;  %v362_v39 = vcombine.high %v344_v25, %v344_v25  ;;  %v317_v42 = vrot.slane %v285_v22, %v1011_v10  ;;  %v540_v46 = vld [vmem:[%s1330_s2 + $0x8] sm:$0xff] }
   0xc   :  { %v480_v43 = vcombine.high %v462_v30, %v462_v30  ;;  %v435_v45 = vrot.slane %v403_v27, %v1011_v10  ;;  %vm449_vm7 = vcmask 744448   ;;  %vm508_vm8 = vcmask 736256  }
   0xd   :  { %141 = vrot.lane.b32.xlu1 %v118_v13, %s973_s19  ;;  %83 = vrot.lane.b32.xlu0 %v118_v13, %s972_s16  ;;  %v376_v41 = vrot.slane %v362_v39, %v1011_v10  ;;  %vm655_vm9 = vcmask 1041408   ;;  %vm648_vm10 = vcmask 293888  }
   0xe   :  { %v494_v44 = vrot.slane %v480_v43, %v1011_v10 }
  0x11   :  { %145 = vrot.lane.b32.xlu1 %v133_v15, %s973_s19  ;;  %143 = vrot.lane.b32.xlu0 %v125_v16, %s973_s19 }
  0x15   :  { %202 = vrot.lane.b32.xlu1 %v118_v13, %s974_s22  ;;  %200 = vrot.lane.b32.xlu0 %v58_v12, %s974_s22 }
  0x19   :  { %259 = vrot.lane.b32.xlu1 %v118_v13, %s975_s25  ;;  %204 = vrot.lane.b32.xlu0 %v192_v19, %s974_s22 }
  0x1d   :  { %263 = vrot.lane.b32.xlu1 %v251_v21, %s975_s25  ;;  %261 = vrot.lane.b32.xlu0 %v125_v16, %s975_s25 }
  0x21   :  { %320 = vrot.lane.b32.xlu1 %v118_v13, %s976_s28  ;;  %318 = vrot.lane.b32.xlu0 %v58_v12, %s976_s28 }
  0x25   :  { %377 = vrot.lane.b32.xlu1 %v118_v13, %s977_s4  ;;  %322 = vrot.lane.b32.xlu0 %v310_v24, %s976_s28 }
  0x29   :  { %381 = vrot.lane.b32.xlu1 %v369_v26, %s977_s4  ;;  %379 = vrot.lane.b32.xlu0 %v125_v16, %s977_s4 }
  0x2d   :  { %438 = vrot.lane.b32.xlu1 %v118_v13, %s978_s7  ;;  %436 = vrot.lane.b32.xlu0 %v58_v12, %s978_s7 }
  0x31   :  { %495 = vrot.lane.b32.xlu1 %v118_v13, %s979_s12  ;;  %440 = vrot.lane.b32.xlu0 %v428_v29, %s978_s7 }
  0x35   :  { %499 = vrot.lane.b32.xlu1 %v487_v32, %s979_s12  ;;  %497 = vrot.lane.b32.xlu0 %v125_v16, %s979_s12 }
  0x39   :  { %147 = vrot.lane.b32.xlu1 %v140_v34, %s973_s19  ;;  %87 = vrot.lane.b32.xlu0 %v80_v35, %s972_s16 }
  0x3d   :  { %265 = vrot.lane.b32.xlu1 %v258_v37, %s975_s25  ;;  %206 = vrot.lane.b32.xlu0 %v199_v38, %s974_s22 }
  0x41   :  { %383 = vrot.lane.b32.xlu1 %v376_v41, %s977_s4  ;;  %324 = vrot.lane.b32.xlu0 %v317_v42, %s976_s28 }
  0x45   :  { %501 = vrot.lane.b32.xlu1 %v494_v44, %s979_s12  ;;  %442 = vrot.lane.b32.xlu0 %v435_v45, %s978_s7 }
  0x49   :  { %550 = vperm.xlu1 %934, %v540_v46   ;;  %545 = vperm.xlu0 %933, %v539_v47  }
  0x4d   :  { %555 = vperm.xlu1 %934, %v541_v48   ;;  %560 = vperm.xlu0 %933, %v542_v49  }
  0x7b   :  { %v1105_v50 = vpop.permute.xlu1 %85  ;;  %v82_v51 = vpop.permute.xlu0 %81 }
  0x7c   :  { %v91_v52 = vrot.slane %v1105_v50, 4  ;;  %v89_v55 = vrot.slane %v82_v51, 4 }
  0x7f   :  { %v142_v53 = vpop.permute.xlu1 %141  ;;  %v84_v54 = vpop.permute.xlu0 %83 }
  0x80   :  { %v90_v56 = vrot.slane %v84_v54, 4  ;;  %v149_v57 = vrot.slane %v142_v53, 4 }
  0x82   :  { %v94_v58 = vsel %vm93_vm0, %v89_v55, %v90_v56  ;;  %v97_v59 = vsel %vm93_vm0, %v90_v56, %v91_v52 }
  0x83   :  { %v96_v60 = vsel %vm95_vm1, %v82_v51, %v94_v58  ;;  %v98_v61 = vsel %vm95_vm1, %v84_v54, %v97_v59  ;;  %v1114_v62 = vpop.permute.xlu1 %145  ;;  %v144_v63 = vpop.permute.xlu0 %143 }
  0x84   :  { %104 = vst [vmem:[#allocation2] sm:$0xcc] %v96_v60  ;;  %105 = vst [vmem:[#allocation2 + $0x8] sm:$0xcc] %v98_v61  ;;  %v151_v0 = vrot.slane %v1114_v62, 4  ;;  %v150_v1 = vrot.slane %v144_v63, 4 }
  0x86   :  { %v153_v2 = vsel %vm93_vm0, %v149_v57, %v150_v1  ;;  %v156_v3 = vsel %vm93_vm0, %v150_v1, %v151_v0 }
  0x87   :  { %v155_v4 = vsel %vm154_vm2, %v142_v53, %v153_v2  ;;  %v157_v5 = vsel %vm154_vm2, %v144_v63, %v156_v3  ;;  %v203_v6 = vpop.permute.xlu1 %202  ;;  %v201_v7 = vpop.permute.xlu0 %200 }
  0x88   :  { %163 = vst [vmem:[#allocation2 + $0x18] sm:$0x33] %v155_v4  ;;  %164 = vst [vmem:[#allocation2 + $0x20] sm:$0x33] %v157_v5  ;;  %v209_v8 = vrot.slane %v203_v6, 4  ;;  %v208_v9 = vrot.slane %v201_v7, 4 }
  0x8a   :  { %v212_v10 = vsel %vm93_vm0, %v208_v9, %v209_v8 }
  0x8b   :  { %v214_v11 = vsel %vm213_vm3, %v201_v7, %v212_v10  ;;  %v260_v12 = vpop.permute.xlu1 %259  ;;  %v1125_v13 = vpop.permute.xlu0 %204 }
  0x8c   :  { %222 = vst [vmem:[#allocation2 + $0x18] sm:$0xcc] %v214_v11  ;;  %v210_v14 = vrot.slane %v1125_v13, 4  ;;  %v267_v15 = vrot.slane %v260_v12, 4 }
  0x8e   :  { %v215_v16 = vsel %vm93_vm0, %v209_v8, %v210_v14 }
  0x8f   :  { %v216_v17 = vsel %vm213_vm3, %v203_v6, %v215_v16  ;;  %v1132_v18 = vpop.permute.xlu1 %263  ;;  %v262_v19 = vpop.permute.xlu0 %261 }
  0x90   :  { %223 = vst [vmem:[#allocation2 + $0x20] sm:$0xcc] %v216_v17  ;;  %v269_v20 = vrot.slane %v1132_v18, 4  ;;  %v268_v21 = vrot.slane %v262_v19, 4 }
  0x92   :  { %v271_v22 = vsel %vm93_vm0, %v267_v15, %v268_v21  ;;  %v274_v23 = vsel %vm93_vm0, %v268_v21, %v269_v20 }
  0x93   :  { %v273_v24 = vsel %vm272_vm4, %v260_v12, %v271_v22  ;;  %v275_v25 = vsel %vm272_vm4, %v262_v19, %v274_v23  ;;  %v321_v26 = vpop.permute.xlu1 %320  ;;  %v319_v27 = vpop.permute.xlu0 %318  ;;  %v945_v28 = vld [vmem:[#allocation2 + $0x4] ss:$24 sps:$4 sm:$0xff]   ;;  %v947_v29 = vld [vmem:[#allocation2] ss:$24 sps:$4 sm:$0xff]  }
  0x94   :  { %281 = vst [vmem:[#allocation2 + $0x30] sm:$0x33] %v273_v24  ;;  %282 = vst [vmem:[#allocation2 + $0x38] sm:$0x33] %v275_v25  ;;  %v327_v30 = vrot.slane %v321_v26, 4  ;;  %v326_v31 = vrot.slane %v319_v27, 4  ;;  %674 = vmatprep.subr.bf16.mxu0 %v945_v28 }
  0x95   :  { %675 = vmatpush1.bf16.msra.mxu0 %v947_v29 }
  0x96   :  { %v330_v32 = vsel %vm93_vm0, %v326_v31, %v327_v30 }
  0x97   :  { %v332_v33 = vsel %vm331_vm5, %v319_v27, %v330_v32  ;;  %v378_v34 = vpop.permute.xlu1 %377  ;;  %v1143_v35 = vpop.permute.xlu0 %322  ;;  %v948_v36 = vld [vmem:[#allocation2 + $0xc] ss:$24 sps:$4 sm:$0xff]   ;;  %v950_v37 = vld [vmem:[#allocation2 + $0x8] ss:$24 sps:$4 sm:$0xff]  }
  0x98   :  { %340 = vst [vmem:[#allocation2 + $0x30] sm:$0xcc] %v332_v33  ;;  %v328_v38 = vrot.slane %v1143_v35, 4  ;;  %727 = vmatprep.subr.bf16.mxu1 %v948_v36  ;;  %v385_v39 = vrot.slane %v378_v34, 4 }
  0x99   :  { %728 = vmatpush1.bf16.msra.mxu1 %v950_v37 }
  0x9a   :  { %v333_v41 = vsel %vm93_vm0, %v327_v30, %v328_v38 }
  0x9b   :  { %v334_v42 = vsel %vm331_vm5, %v321_v26, %v333_v41  ;;  %v1150_v43 = vpop.permute.xlu1 %381  ;;  %v380_v44 = vpop.permute.xlu0 %379 }
  0x9c   :  { %341 = vst [vmem:[#allocation2 + $0x38] sm:$0xcc] %v334_v42  ;;  %v387_v45 = vrot.slane %v1150_v43, 4  ;;  %v386_v46 = vrot.slane %v380_v44, 4 }
  0x9e   :  { %v389_v47 = vsel %vm93_vm0, %v385_v39, %v386_v46  ;;  %v392_v48 = vsel %vm93_vm0, %v386_v46, %v387_v45 }
  0x9f   :  { %v391_v49 = vsel %vm390_vm6, %v378_v34, %v389_v47  ;;  %v393_v51 = vsel %vm390_vm6, %v380_v44, %v392_v48  ;;  %v439_v53 = vpop.permute.xlu1 %438  ;;  %v437_v54 = vpop.permute.xlu0 %436 }
  0xa0   :  { %399 = vst [vmem:[#allocation2 + $0x48] sm:$0x33] %v391_v49  ;;  %400 = vst [vmem:[#allocation2 + $0x50] sm:$0x33] %v393_v51  ;;  %v445_v55 = vrot.slane %v439_v53, 4  ;;  %v444_v56 = vrot.slane %v437_v54, 4 }
  0xa2   :  { %v448_v57 = vsel %vm93_vm0, %v444_v56, %v445_v55 }
  0xa3   :  { %v450_v58 = vsel %vm449_vm7, %v437_v54, %v448_v57  ;;  %v496_v59 = vpop.permute.xlu1 %495  ;;  %v1161_v60 = vpop.permute.xlu0 %440  ;;  %v965_v57 = vld [vmem:[%s1329_s1 + $0x8] sm:$0xff]  }
  0xa4   :  { %458 = vst [vmem:[#allocation2 + $0x48] sm:$0xcc] %v450_v58  ;;  %v446_v61 = vrot.slane %v1161_v60, 4  ;;  %v503_v63 = vrot.slane %v496_v59, 4 }
  0xa6   :  { %v451_v1 = vsel %vm93_vm0, %v445_v55, %v446_v61 }
  0xa7   :  { %v452_v2 = vsel %vm449_vm7, %v439_v53, %v451_v1  ;;  %v1168_v3 = vpop.permute.xlu1 %499  ;;  %v498_v4 = vpop.permute.xlu0 %497 }
  0xa8   :  { %459 = vst [vmem:[#allocation2 + $0x50] sm:$0xcc] %v452_v2  ;;  %v505_v5 = vrot.slane %v1168_v3, 4  ;;  %v504_v6 = vrot.slane %v498_v4, 4 }
  0xaa   :  { %v507_v7 = vsel %vm93_vm0, %v503_v63, %v504_v6  ;;  %v510_v8 = vsel %vm93_vm0, %v504_v6, %v505_v5 }
  0xab   :  { %v509_v9 = vsel %vm508_vm8, %v496_v59, %v507_v7  ;;  %v511_v10 = vsel %vm508_vm8, %v498_v4, %v510_v8  ;;  %v148_v11 = vpop.permute.xlu1 %147  ;;  %v88_v12 = vpop.permute.xlu0 %87  ;;  %v951_v15 = vld [vmem:[#allocation2 + $0x34] ss:$24 sps:$4 sm:$0xff]   ;;  %v953_v16 = vld [vmem:[#allocation2 + $0x30] ss:$24 sps:$4 sm:$0xff]  }
  0xac   :  { %517 = vst [vmem:[#allocation2 + $0x60] sm:$0x33] %v509_v9  ;;  %518 = vst [vmem:[#allocation2 + $0x68] sm:$0x33] %v511_v10  ;;  %v152_v17 = vrot.slane %v148_v11, 4  ;;  %v92_v19 = vrot.slane %v88_v12, 4  ;;  %676 = vmatprep.subr.bf16.mxu0 %v951_v15 }
  0xad   :  { %677 = vmatpush1.bf16.msra.mxu0 %v953_v16 }
  0xae   :  { %v158_v21 = vsel %vm93_vm0, %v151_v0, %v152_v17  ;;  %v99_v22 = vsel %vm93_vm0, %v91_v52, %v92_v19 }
  0xaf   :  { %v159_v23 = vsel %vm154_vm2, %v1114_v62, %v158_v21  ;;  %v100_v24 = vsel %vm95_vm1, %v1105_v50, %v99_v22  ;;  %v266_v25 = vpop.permute.xlu1 %265  ;;  %v207_v26 = vpop.permute.xlu0 %206  ;;  %v954_v27 = vld [vmem:[#allocation2 + $0x3c] ss:$24 sps:$4 sm:$0xff]   ;;  %v956_v28 = vld [vmem:[#allocation2 + $0x38] ss:$24 sps:$4 sm:$0xff]  }
  0xb0   :  { %165 = vst [vmem:[#allocation2 + $0x28] sm:$0x33] %v159_v23  ;;  %106 = vst [vmem:[#allocation2 + $0x10] sm:$0xcc] %v100_v24  ;;  %v270_v29 = vrot.slane %v266_v25, 4  ;;  %v211_v30 = vrot.slane %v207_v26, 4  ;;  %729 = vmatprep.subr.bf16.mxu1 %v954_v27 }
  0xb1   :  { %730 = vmatpush1.bf16.msra.mxu1 %v956_v28 }
  0xb2   :  { %v276_v52 = vsel %vm93_vm0, %v269_v20, %v270_v29  ;;  %v217_v62 = vsel %vm93_vm0, %v210_v14, %v211_v30 }
  0xb3   :  { %v277_v50 = vsel %vm272_vm4, %v1132_v18, %v276_v52  ;;  %v218_v0 = vsel %vm213_vm3, %v1125_v13, %v217_v62  ;;  %v384_v31 = vpop.permute.xlu1 %383  ;;  %v325_v32 = vpop.permute.xlu0 %324  ;;  %v536_v33 = vld [vmem:[#allocation2 + $0x60] sm:$0x33]  ;;  %v537_v34 = vld [vmem:[#allocation2 + $0x68] sm:$0x33] }
  0xb4   :  { %283 = vst [vmem:[#allocation2 + $0x40] sm:$0x33] %v277_v50  ;;  %224 = vst [vmem:[#allocation2 + $0x28] sm:$0xcc] %v218_v0  ;;  %v388_v36 = vrot.slane %v384_v31, 4  ;;  %v329_v20 = vrot.slane %v325_v32, 4  ;;  %v903_v37 = vcombine.high %v536_v33, %v536_v33  ;;  %v905_v39 = vcombine.high %v537_v34, %v537_v34 }
  0xb5   :  { %v902_v41 = vcombine.low %v536_v33, %v536_v33  ;;  %v904_v14 = vcombine.low %v537_v34, %v537_v34 }
  0xb6   :  { %v394_v18 = vsel %vm93_vm0, %v387_v45, %v388_v36  ;;  %v335_v13 = vsel %vm93_vm0, %v328_v38, %v329_v20  ;;  %908 = vmatprep.subr.msk.bf16.mxu0 %vm655_vm9, %v903_v37  ;;  %911 = vmatprep.subr.msk.bf16.mxu1 %vm655_vm9, %v905_v39  ;;  %v961_v38 = vld [vmem:[%s1329_s1] sm:$0xff]  }
  0xb7   :  { %v395_v42 = vsel %vm390_vm6, %v1150_v43, %v394_v18  ;;  %v336_v44 = vsel %vm331_vm5, %v1143_v35, %v335_v13  ;;  %v502_v46 = vpop.permute.xlu1 %501  ;;  %v443_v47 = vpop.permute.xlu0 %442  ;;  %v657_v48 = vsel %vm655_vm9, %v902_v41, 0  ;;  %v663_v45 = vsel %vm655_vm9, %v904_v14, 0 }
  0xb8   :  { %401 = vst [vmem:[#allocation2 + $0x58] sm:$0x33] %v395_v42  ;;  %342 = vst [vmem:[#allocation2 + $0x40] sm:$0xcc] %v336_v44  ;;  %v506_v49 = vrot.slane %v502_v46, 4  ;;  %v447_v51 = vrot.slane %v443_v47, 4  ;;  %679 = vmatpush1.bf16.msra.mxu0 %v657_v48  ;;  %732 = vmatpush1.bf16.msra.mxu1 %v663_v45 }
  0xba   :  { %v512_v35 = vsel %vm93_vm0, %v505_v5, %v506_v49  ;;  %v453_v43 = vsel %vm93_vm0, %v446_v61, %v447_v51 }
  0xbb   :  { %v513_v53 = vsel %vm508_vm8, %v1168_v3, %v512_v35  ;;  %v454_v54 = vsel %vm449_vm7, %v1161_v60, %v453_v43  ;;  %909 = vmatmul.mubr.msk.bf16.vlgmr.msra.gmra.mrb[0].mxu0 %vm648_vm10, %v961_v38  ;;  %912 = vmatmul.mubr.msk.bf16.vlgmr.msra.gmra.mrb[0].mxu1 %vm648_vm10, %v961_v38  ;;  %v962_v55 = vld [vmem:[#allocation2 + $0x10] ss:$24 sps:$4 sm:$0xff]   ;;  %v964_v56 = vld [vmem:[#allocation2 + $0x14] ss:$24 sps:$4 sm:$0xff]  }
  0xbc   :  { %519 = vst [vmem:[#allocation2 + $0x70] sm:$0x33] %v513_v53  ;;  %460 = vst [vmem:[#allocation2 + $0x58] sm:$0xcc] %v454_v54  ;;  %716 = vmatprep.mubr.bf16.mxu0 %v980_v40  ;;  %769 = vmatprep.mubr.bf16.mxu1 %v980_v40 }
  0xbd   :  { %780 = vmatprep.subr.bf16.mxu0 %v964_v56  ;;  %917 = vmatprep.subr.bf16.mxu1 %v964_v56 }
  0xbe   :  { %781 = vmatpush1.bf16.msra.mxu0 %v962_v55  ;;  %920 = vmatpush1.bf16.msra.mxu1 %v962_v55 }
  0xc3   :  { %910 = vmatmul.mubr.msk.bf16.gmra.mrb[4].mxu0 %vm648_vm10, %v965_v57  ;;  %913 = vmatmul.mubr.msk.bf16.gmra.mrb[4].mxu1 %vm648_vm10, %v965_v57  ;;  %v966_v58 = vld [vmem:[#allocation2 + $0x40] ss:$24 sps:$4 sm:$0xff]   ;;  %v968_v59 = vld [vmem:[#allocation2 + $0x44] ss:$24 sps:$4 sm:$0xff]   ;;  %v538_v60 = vld [vmem:[#allocation2 + $0x70] sm:$0x33] }
  0xc4   :  { %812 = vmatprep.mubr.bf16.mxu0 %v980_v40  ;;  %822 = vmatprep.mubr.bf16.mxu1 %v980_v40  ;;  %v907_v61 = vcombine.high %v538_v60, %v538_v60  ;;  %v906_v63 = vcombine.low %v538_v60, %v538_v60 }
  0xc5   :  { %782 = vmatprep.subr.bf16.mxu0 %v968_v59  ;;  %918 = vmatprep.subr.bf16.mxu1 %v968_v59 }
  0xc6   :  { %783 = vmatpush1.bf16.msra.mxu0 %v966_v58  ;;  %921 = vmatpush1.bf16.msra.mxu1 %v966_v58  ;;  %v669_v1 = vsel %vm655_vm9, %v906_v63, 0 }
  0xc7   :  { %914 = vmatprep.subr.msk.bf16.mxu0 %vm655_vm9, %v907_v61  ;;  %919 = vmatprep.subr.msk.bf16.mxu1 %vm655_vm9, %v907_v61 }
  0xc8   :  { %v1240_v2 = vpop.permute.xlu0 %545  ;;  %v1242_v40 = vpop.permute.xlu1 %550 }
  0xca   :  { %785 = vmatpush1.bf16.msra.mxu0 %v669_v1  ;;  %922 = vmatpush1.bf16.msra.mxu1 %v669_v1 }
  0xcc   :  { %v556_v52 = vpop.permute.xlu1 %555  ;;  %v561_v62 = vpop.permute.xlu0 %560 }
  0xcd   :  { %915 = vmatmul.mubr.msk.bf16.vlgmr.msra.gmra.mrb[8].mxu0 %vm648_vm10, %v961_v38  ;;  %916 = vmatmul.mubr.msk.bf16.vlgmr.msra.gmra.mrb[8].mxu1 %vm648_vm10, %v965_v57 }
 0x18e   :  { %v708_v3 = vpop.f32.mrb[0].mxu0  ;;  %v761_v4 = vpop.f32.mrb[0].mxu1 }
 0x18f   :  { %v710_v5 = vpop.f32.mrb[1].mxu0  ;;  %v763_v6 = vpop.f32.mrb[1].mxu1  ;;  %v709_v7 = vadd.f32 %v708_v3, %v1240_v2  ;;  %v762_v8 = vadd.f32 %v761_v4, %v1240_v2 }
 0x190   :  { %v712_v9 = vpop.f32.mrb[2].mxu0  ;;  %v765_v10 = vpop.f32.mrb[2].mxu1  ;;  %v711_v11 = vadd.f32 %v710_v5, %v1240_v2  ;;  %v764_v12 = vadd.f32 %v763_v6, %v1240_v2 }
 0x191   :  { %v713_v15 = vadd.f32 %v712_v9, %v1242_v40  ;;  %v766_v16 = vadd.f32 %v765_v10, %v1242_v40  ;;  %v833_v17 = vmax.f32 %v709_v7, 0.0  ;;  %v835_v19 = vmax.f32 %v762_v8, 0.0  ;;  %v714_v21 = vpop.f32.mrb[3].mxu0  ;;  %v767_v22 = vpop.f32.mrb[3].mxu1 }
 0x192   :  { %v834_v23 = vmax.f32 %v711_v11, 0.0  ;;  %v836_v24 = vmax.f32 %v764_v12, 0.0  ;;  %v715_v25 = vadd.f32 %v714_v21, %v1242_v40  ;;  %v768_v26 = vadd.f32 %v767_v22, %v1242_v40 }
 0x193   :  { %v839_v27 = vmax.f32 %v713_v15, 0.0  ;;  %v841_v28 = vmax.f32 %v766_v16, 0.0  ;;  %857 = vst [vmem:[%s1331_s3] sm:$0xff] %v833_v17  ;;  %859 = vst [vmem:[%s1331_s3 + $0x10] sm:$0xff] %v835_v19 }
 0x194   :  { %858 = vst [vmem:[%s1331_s3 + $0x8] sm:$0xff] %v834_v23  ;;  %860 = vst [vmem:[%s1331_s3 + $0x18] sm:$0xff] %v836_v24  ;;  %v840_v29 = vmax.f32 %v715_v25, 0.0  ;;  %v842_v30 = vmax.f32 %v768_v26, 0.0 }
 0x195   :  { %863 = vst [vmem:[%s1331_s3 + $0x30] sm:$0xff] %v839_v27  ;;  %865 = vst [vmem:[%s1331_s3 + $0x40] sm:$0xff] %v841_v28 }
 0x196   :  { %864 = vst [vmem:[%s1331_s3 + $0x38] sm:$0xff] %v840_v29  ;;  %866 = vst [vmem:[%s1331_s3 + $0x48] sm:$0xff] %v842_v30  ;;  %v718_v50 = vpop.f32.mrb[4].mxu0  ;;  %v771_v0 = vpop.f32.mrb[4].mxu1 }
 0x197   :  { %v720_v31 = vpop.f32.mrb[5].mxu0  ;;  %v773_v32 = vpop.f32.mrb[5].mxu1  ;;  %v719_v33 = vadd.f32 %v718_v50, %v556_v52  ;;  %v772_v34 = vadd.f32 %v771_v0, %v556_v52 }
 0x198   :  { %v722_v36 = vpop.f32.mrb[6].mxu0  ;;  %v775_v20 = vpop.f32.mrb[6].mxu1  ;;  %v721_v37 = vadd.f32 %v720_v31, %v556_v52  ;;  %v774_v39 = vadd.f32 %v773_v32, %v556_v52 }
 0x199   :  { %v845_v41 = vmax.f32 %v719_v33, 0.0  ;;  %v847_v14 = vmax.f32 %v772_v34, 0.0  ;;  %v723_v18 = vadd.f32 %v722_v36, %v561_v62  ;;  %v776_v13 = vadd.f32 %v775_v20, %v561_v62  ;;  %v724_v42 = vpop.f32.mrb[7].mxu0  ;;  %v777_v44 = vpop.f32.mrb[7].mxu1 }
 0x19a   :  { %v846_v46 = vmax.f32 %v721_v37, 0.0  ;;  %v848_v47 = vmax.f32 %v774_v39, 0.0  ;;  %v725_v48 = vadd.f32 %v724_v42, %v561_v62  ;;  %v778_v45 = vadd.f32 %v777_v44, %v561_v62 }
 0x19b   :  { %869 = vst [vmem:[%s1331_s3 + $0x60] sm:$0xff] %v845_v41  ;;  %871 = vst [vmem:[%s1331_s3 + $0x70] sm:$0xff] %v847_v14  ;;  %v851_v38 = vmax.f32 %v723_v18, 0.0  ;;  %v853_v49 = vmax.f32 %v776_v13, 0.0 }
 0x19c   :  { %870 = vst [vmem:[%s1331_s3 + $0x68] sm:$0xff] %v846_v46  ;;  %872 = vst [vmem:[%s1331_s3 + $0x78] sm:$0xff] %v848_v47  ;;  %v852_v51 = vmax.f32 %v725_v48, 0.0  ;;  %v854_v35 = vmax.f32 %v778_v45, 0.0 }
 0x19d   :  { %875 = vst [vmem:[%s1331_s3 + $0x90] sm:$0xff] %v851_v38  ;;  %877 = vst [vmem:[%s1331_s3 + $0xa0] sm:$0xff] %v853_v49 }
 0x19e   :  { %876 = vst [vmem:[%s1331_s3 + $0x98] sm:$0xff] %v852_v51  ;;  %878 = vst [vmem:[%s1331_s3 + $0xa8] sm:$0xff] %v854_v35 }
 0x1a0   :  { %v814_v43 = vpop.f32.mrb[8].mxu0  ;;  %v824_v53 = vpop.f32.mrb[8].mxu1 }
 0x1a1   :  { %v815_v54 = vadd.f32 %v814_v43, %v1240_v2  ;;  %v825_v55 = vadd.f32 %v824_v53, %v556_v52  ;;  %v816_v56 = vpop.f32.mrb[9].mxu0  ;;  %v826_v57 = vpop.f32.mrb[9].mxu1 }
 0x1a2   :  { %v817_v58 = vadd.f32 %v816_v56, %v1240_v2  ;;  %v827_v59 = vadd.f32 %v826_v57, %v556_v52  ;;  %v818_v60 = vpop.f32.mrb[10].mxu0  ;;  %v828_v61 = vpop.f32.mrb[10].mxu1 }
 0x1a3   :  { %v837_v63 = vmax.f32 %v815_v54, 0.0  ;;  %v849_v1 = vmax.f32 %v825_v55, 0.0  ;;  %v819_v3 = vadd.f32 %v818_v60, %v1242_v40  ;;  %v829_v4 = vadd.f32 %v828_v61, %v561_v62  ;;  %v820_v5 = vpop.f32.mrb[11].mxu0  ;;  %v830_v6 = vpop.f32.mrb[11].mxu1 }
 0x1a4   :  { %v838_v7 = vmax.f32 %v817_v58, 0.0  ;;  %v850_v8 = vmax.f32 %v827_v59, 0.0  ;;  %v821_v9 = vadd.f32 %v820_v5, %v1242_v40  ;;  %v831_v10 = vadd.f32 %v830_v6, %v561_v62 }
 0x1a5   :  { %861 = vst [vmem:[%s1331_s3 + $0x20] sm:$0xff] %v837_v63  ;;  %873 = vst [vmem:[%s1331_s3 + $0x80] sm:$0xff] %v849_v1  ;;  %v843_v2 = vmax.f32 %v819_v3, 0.0  ;;  %v855_v11 = vmax.f32 %v829_v4, 0.0 }
 0x1a6   :  { %862 = vst [vmem:[%s1331_s3 + $0x28] sm:$0xff] %v838_v7  ;;  %874 = vst [vmem:[%s1331_s3 + $0x88] sm:$0xff] %v850_v8  ;;  %v844_v40 = vmax.f32 %v821_v9, 0.0  ;;  %v856_v12 = vmax.f32 %v831_v10, 0.0 }
 0x1a7   :  { %867 = vst [vmem:[%s1331_s3 + $0x50] sm:$0xff] %v843_v2  ;;  %879 = vst [vmem:[%s1331_s3 + $0xb0] sm:$0xff] %v855_v11 }
 0x1a8   :  { %868 = vst [vmem:[%s1331_s3 + $0x58] sm:$0xff] %v844_v40  ;;  %880 = vst [vmem:[%s1331_s3 + $0xb8] sm:$0xff] %v856_v12 }

</bundles_post_ra>
